<compile_context>
chip_gen: v7x
topology: tpu7x:2x2x1
jax: 0.10.0
libtpu: 0.0.40
codegen_flags: <defaults>
</compile_context>

<pallas_src>
import math
from functools import partial

import jax
import jax.numpy as jnp
from jax import lax
from jax.experimental import pallas as pl
from jax.experimental.pallas import tpu as pltpu

EPS = 1e-5  # nn.LayerNorm default


def _layer_norm(x, w, b):
    # x: (N, D) fp32, w/b: (1, D) fp32
    mu = jnp.mean(x, axis=-1, keepdims=True)
    var = jnp.mean((x - mu) ** 2, axis=-1, keepdims=True)
    return (x - mu) * lax.rsqrt(var + EPS) * w + b


# --------------------------- KV pre-pass kernel ---------------------------------------
def _kv_prepass_kernel(x_ref, ln1_w, ln1_b, kv_w, kv_b, kv_ref):
    x = x_ref[0].astype(jnp.float32)                                   # (TKV, D)
    x_ln = _layer_norm(x, ln1_w[...], ln1_b[...])
    kv = jnp.dot(x_ln.astype(jnp.bfloat16), kv_w[...],
                 preferred_element_type=jnp.float32) + kv_b[...]       # (TKV, 2D) fp32
    kv_ref[0] = kv.astype(kv_ref.dtype)                                # -> bf16


# --------------------------- main encoder kernel --------------------------------------
def _encoder_kernel(num_heads, head_dim, embed_dim, use_single_proj,
                    x_ref, kv_ref,
                    ln1_w, ln1_b,
                    q_w, q_b,              # (D, D)  bf16, (1, D)  f32
                    out_w, out_b,          # (D, D)  bf16, (1, D)  f32
                    ln2_w, ln2_b,
                    fc1_w, fc1_b,          # (D, Dh) bf16, (1, Dh) f32
                    fc2_w, fc2_b,          # (Dh, D) bf16, (1, D)  f32
                    o_ref, s_scr, *opt_scr):
    D, hd = embed_dim, head_dim
    scale = 1.0 / math.sqrt(hd)
    bf16, f32 = jnp.bfloat16, jnp.float32

    x_q = x_ref[0].astype(f32)                                         # (TQ, D) residual base
    xq_ln = _layer_norm(x_q, ln1_w[...], ln1_b[...])
    q_bf = (jnp.dot(xq_ln.astype(bf16), q_w[...],
                    preferred_element_type=f32) + q_b[...]).astype(bf16)   # (TQ, D)

    attn_scr = opt_scr[0] if use_single_proj else None
    acc = None if use_single_proj else jnp.zeros((x_q.shape[0], D), f32)

    for h in range(num_heads):
        lo = h * hd
        qh = q_bf[:, lo:lo + hd]                                       # (TQ, hd) bf16
        kh = kv_ref[0, :, lo:lo + hd]                                  # (S,  hd) bf16
        vh = kv_ref[0, :, D + lo:D + lo + hd]                          # (S,  hd) bf16

        # Scores go through one VMEM scratch to bound live ranges across the unrolled
        # head loop. dot_general contracting dims (1,1) = Q @ K^T via the MXU's
        # transposed-RHS operand path (no explicit XLU transpose of K).
        s_scr[...] = lax.dot_general(qh, kh, (((1,), (1,)), ((), ())),
                                     preferred_element_type=f32) * scale
        s = s_scr[...]
        s = s - jnp.max(s, axis=-1, keepdims=True)
        p = jnp.exp(s)
        p = p * pl.reciprocal(jnp.sum(p, axis=-1, keepdims=True), approx=True)

        oh = jnp.dot(p.astype(bf16), vh, preferred_element_type=f32)   # (TQ, hd)
        if use_single_proj:
            # head_dim % 128 == 0: lane-aligned writes, one big projection afterwards.
            attn_scr[:, lo:lo + hd] = oh.astype(bf16)
        else:
            # head_dim < 128: fold the output projection into the head loop
            # ((TQ,hd)@(hd,D) with full N=D keeps the MXU columns filled).
            acc = acc + jnp.dot(oh.astype(bf16), out_w[lo:lo + hd, :],
                                preferred_element_type=f32)

    if use_single_proj:
        acc = jnp.dot(attn_scr[...], out_w[...], preferred_element_type=f32)

    x1 = x_q + acc + out_b[...]                                        # residual 1

    # ---- MLP ----
    x_ln2 = _layer_norm(x1, ln2_w[...], ln2_b[...])
    h1 = jnp.dot(x_ln2.astype(bf16), fc1_w[...],
                 preferred_element_type=f32) + fc1_b[...]
    h1 = jax.nn.gelu(h1, approximate=False)                            # exact erf GELU
    h2 = jnp.dot(h1.astype(bf16), fc2_w[...],
                 preferred_element_type=f32) + fc2_b[...]

    o_ref[0] = (x1 + h2).astype(o_ref.dtype)                           # residual 2


# --------------------------- wrapper ----------------------------------------------------
def _largest_divisor_leq(n, cap):
    cap = max(1, min(cap, n))
    for d in range(cap, 0, -1):
        if n % d == 0:
            return d
    return n


def _vmem_budget_bytes():
    # Per-generation VMEM budget with ~20% headroom for Mosaic internal scratch:
    # ~102 MiB on v5e/v6e (128 MiB physical), ~51 MiB on v7x (64 MiB physical).
    try:
        cap = int(pltpu.get_tpu_info().vmem_capacity_bytes)
    except Exception:
        cap = 64 * 1024 * 1024  # conservative (v7x-sized) fallback
    return int(cap * 0.8)


def _const_spec(w, single_buffer):
    # Grid-invariant weight block. Single-buffered when supported (block index never
    # changes, so double-buffering would only double resident VMEM).
    n = w.ndim
    if single_buffer:
        return pl.BlockSpec(w.shape, lambda b, t, n=n: (0,) * n,
                            pipeline_mode=pl.Buffered(1))
    return pl.BlockSpec(w.shape, lambda b, t, n=n: (0,) * n)


def _transformer_encoder_impl(x, params, num_heads, q_tile, single_buffer_weights):
    B, S, D = x.shape
    head_dim = D // num_heads
    f32, bf16 = jnp.float32, jnp.bfloat16

    vmem_budget = _vmem_budget_bytes()
    if q_tile is None:
        q_tile = 512 if vmem_budget >= 80 * 1024 * 1024 else 256
    tq = _largest_divisor_leq(S, q_tile)       # never overshoots the requested tile
    nq = S // tq
    tkv = _largest_divisor_leq(S, 512)
    nkv = S // tkv

    mlp_hidden = params["fc1_wT"].shape[1]

    # Split the fused in_proj into Q and KV parts; large matmul weights go in as bf16
    # (MXU operands), LayerNorm params and biases stay fp32.
    qkv_wT, qkv_b = params["qkv_wT"], params["qkv_b"]
    ln1_w = params["ln1_w"].astype(f32)
    ln1_b = params["ln1_b"].astype(f32)
    q_w = qkv_wT[:, :D].astype(bf16)
    q_b = qkv_b[:, :D].astype(f32)
    kv_w = qkv_wT[:, D:].astype(bf16)
    kv_b = qkv_b[:, D:].astype(f32)
    out_w = params["out_wT"].astype(bf16)
    out_b = params["out_b"].astype(f32)
    ln2_w = params["ln2_w"].astype(f32)
    ln2_b = params["ln2_b"].astype(f32)
    fc1_w = params["fc1_wT"].astype(bf16)
    fc1_b = params["fc1_b"].astype(f32)
    fc2_w = params["fc2_wT"].astype(bf16)
    fc2_b = params["fc2_b"].astype(f32)

    cparams = pltpu.CompilerParams(
        dimension_semantics=("parallel", "parallel"),
        vmem_limit_bytes=vmem_budget,
    )

    # ---- pre-pass: KV = LN1(x) @ W_kv + b_kv, computed once per batch, emitted bf16 ----
    kv_weights = [ln1_w, ln1_b, kv_w, kv_b]
    kv = pl.pallas_call(
        _kv_prepass_kernel,
        out_shape=jax.ShapeDtypeStruct((B, S, 2 * D), bf16),
        grid_spec=pltpu.PrefetchScalarGridSpec(
            num_scalar_prefetch=0,
            grid=(B, nkv),
            in_specs=[pl.BlockSpec((1, tkv, D), lambda b, st: (b, st, 0))]
                     + [_const_spec(w, single_buffer_weights) for w in kv_weights],
            out_specs=pl.BlockSpec((1, tkv, 2 * D), lambda b, st: (b, st, 0)),
        ),
        compiler_params=cparams,
        cost_estimate=pl.CostEstimate(
            flops=int(4 * B * S * D * D),
            transcendentals=int(B * S),
            bytes_accessed=int(x.nbytes + B * S * 2 * D * 2
                               + sum(int(w.nbytes) for w in kv_weights)),
        ),
    )(x, *kv_weights)

    # ---- main fused encoder kernel ----
    use_single_proj = (head_dim % 128 == 0)
    weights = [ln1_w, ln1_b, q_w, q_b, out_w, out_b,
               ln2_w, ln2_b, fc1_w, fc1_b, fc2_w, fc2_b]

    scratch_shapes = [pltpu.VMEM((tq, S), f32)]          # per-head scores / probs
    if use_single_proj:
        scratch_shapes.append(pltpu.VMEM((tq, D), bf16))  # assembled attention output

    kernel = partial(_encoder_kernel, num_heads, head_dim, D, use_single_proj)

    flops = int(B * S * (4 * D * D + 4 * S * D + 4 * D * mlp_hidden))
    transcendentals = int(B * num_heads * S * S + B * S * mlp_hidden)
    bytes_accessed = int(2 * x.nbytes + B * S * 2 * D * 2
                         + sum(int(w.nbytes) for w in weights))

    return pl.pallas_call(
        kernel,
        out_shape=jax.ShapeDtypeStruct((B, S, D), x.dtype),
        grid_spec=pltpu.PrefetchScalarGridSpec(
            num_scalar_prefetch=0,
            grid=(B, nq),
            in_specs=[pl.BlockSpec((1, tq, D), lambda b, qt: (b, qt, 0)),      # query rows
                      pl.BlockSpec((1, S, 2 * D), lambda b, qt: (b, 0, 0))]    # bf16 KV (per batch)
                     + [_const_spec(w, single_buffer_weights) for w in weights],
            out_specs=pl.BlockSpec((1, tq, D), lambda b, qt: (b, qt, 0)),
            scratch_shapes=scratch_shapes,
        ),
        compiler_params=cparams,
        cost_estimate=pl.CostEstimate(
            flops=flops,
            transcendentals=transcendentals,
            bytes_accessed=bytes_accessed,
        ),
    )(x, kv, *weights)


def transformer_encoder(x, params, num_heads, q_tile=None):
    """x: (B, S, D) float32. params: transposed PyTorch-layout weights (see __main__)."""
    try:
        return _transformer_encoder_impl(x, params, num_heads, q_tile,
                                         single_buffer_weights=True)
    except Exception:
        # Fallback for jax versions that reject pipeline_mode=pl.Buffered(1) on
        # pallas_call BlockSpecs: use default (double) buffering for the weights.
        return _transformer_encoder_impl(x, params, num_heads, q_tile,
                                         single_buffer_weights=False)


# -------------------- pure-JAX fp32 reference (for verification) --------------------
def reference(x, params, num_heads):
    B, S, D = x.shape
    hd = D // num_heads

    def ln(z, w, b):
        mu = jnp.mean(z, axis=-1, keepdims=True)
        var = jnp.mean((z - mu) ** 2, axis=-1, keepdims=True)
        return (z - mu) / jnp.sqrt(var + EPS) * w[0] + b[0]

    x_ln = ln(x, params["ln1_w"], params["ln1_b"])
    qkv = x_ln @ params["qkv_wT"] + params["qkv_b"][0]
    q, k, v = qkv[..., :D], qkv[..., D:2 * D], qkv[..., 2 * D:]

    def split(z):  # (B,S,D) -> (B,H,S,hd)
        return z.reshape(B, S, num_heads, hd).transpose(0, 2, 1, 3)

    qh, kh, vh = split(q), split(k), split(v)
    s = jnp.einsum("bhqd,bhkd->bhqk", qh, kh) / math.sqrt(hd)
    p = jax.nn.softmax(s, axis=-1)
    o = jnp.einsum("bhqk,bhkd->bhqd", p, vh).transpose(0, 2, 1, 3).reshape(B, S, D)
    o = o @ params["out_wT"] + params["out_b"][0]
    x = x + o

    x_ln2 = ln(x, params["ln2_w"], params["ln2_b"])
    h1 = jax.nn.gelu(x_ln2 @ params["fc1_wT"] + params["fc1_b"][0], approximate=False)
    h2 = h1 @ params["fc2_wT"] + params["fc2_b"][0]
    return x + h2


if __name__ == "__main__":
    B, S, D = 2, 8, 32
    num_heads = 4
    mlp_hidden = int(D * 4.0)

    key = jax.random.PRNGKey(0)
    ks = jax.random.split(key, 9)

    x = jax.random.normal(ks[0], (B, S, D), dtype=jnp.float32)

    # Deterministic synthetic parameters (shapes match nn.MultiheadAttention / nn.Linear).
    # Weights are stored transposed ("wT") so the kernel computes y = x @ W^T + b as x @ wT + b.
    params = {
        "ln1_w": jnp.ones((1, D), jnp.float32),
        "ln1_b": jnp.zeros((1, D), jnp.float32),
        "qkv_wT": 0.02 * jax.random.normal(ks[1], (D, 3 * D), jnp.float32),
        "qkv_b": 0.01 * jax.random.normal(ks[2], (1, 3 * D), jnp.float32),
        "out_wT": 0.02 * jax.random.normal(ks[3], (D, D), jnp.float32),
        "out_b": 0.01 * jax.random.normal(ks[4], (1, D), jnp.float32),
        "ln2_w": jnp.ones((1, D), jnp.float32),
        "ln2_b": jnp.zeros((1, D), jnp.float32),
        "fc1_wT": 0.02 * jax.random.normal(ks[5], (D, mlp_hidden), jnp.float32),
        "fc1_b": 0.01 * jax.random.normal(ks[6], (1, mlp_hidden), jnp.float32),
        "fc2_wT": 0.02 * jax.random.normal(ks[7], (mlp_hidden, D), jnp.float32),
        "fc2_b": jnp.zeros((1, D), jnp.float32),
    }

    # Test 1: single query tile (tq == S).
    out = jax.block_until_ready(transformer_encoder(x, params, num_heads))
    ref = reference(x, params, num_heads)
    assert out.shape == (B, S, D)
    # bf16 MXU operands / bf16 KV cache + approx-reciprocal softmax -> loosened tolerance.
    assert jnp.allclose(out, ref, atol=2e-2, rtol=2e-2), "mismatch vs reference (test 1)"

    # Test 2: exercise the query-tiling path (S=16 split into two 8-row tiles).
    S2 = 16
    x2 = jax.random.normal(ks[8], (B, S2, D), dtype=jnp.float32)
    out2 = jax.block_until_ready(transformer_encoder(x2, params, num_heads, q_tile=8))
    ref2 = reference(x2, params, num_heads)
    assert out2.shape == (B, S2, D)
    assert jnp.allclose(out2, ref2, atol=2e-2, rtol=2e-2), "mismatch vs reference (test 2)"

    print("KERNEL_OK")
</pallas_src>

<mosaic_0001>
module attributes {stable_mosaic.version = 11 : i64} {
  func.func @_kv_prepass_kernel(%arg0: i32, %arg1: i32, %arg2: memref<1x8x32xf32, #tpu.memory_space<vmem>>, %arg3: memref<1x32xf32, #tpu.memory_space<vmem>>, %arg4: memref<1x32xf32, #tpu.memory_space<vmem>>, %arg5: memref<32x64xbf16, #tpu.memory_space<vmem>>, %arg6: memref<1x64xf32, #tpu.memory_space<vmem>>, %arg7: memref<1x8x64xbf16, #tpu.memory_space<vmem>>) attributes {dimension_semantics = [#tpu.dimension_semantics<parallel>, #tpu.dimension_semantics<parallel>], iteration_bounds = array<i64: 2, 1>, scalar_prefetch = 0 : i64, scratch_operands = 0 : i64, tpu.core_type = #tpu.core_type<tc>, window_params = [{transform_indices = @transform_0, window_bounds = array<i64: 1, 8, 32>}, {pipeline_mode = #tpu.pipeline_mode<synchronous>, transform_indices = @transform_1, window_bounds = array<i64: 1, 32>}, {pipeline_mode = #tpu.pipeline_mode<synchronous>, transform_indices = @transform_2, window_bounds = array<i64: 1, 32>}, {pipeline_mode = #tpu.pipeline_mode<synchronous>, transform_indices = @transform_3, window_bounds = array<i64: 32, 64>}, {pipeline_mode = #tpu.pipeline_mode<synchronous>, transform_indices = @transform_4, window_bounds = array<i64: 1, 64>}, {transform_indices = @transform_5, window_bounds = array<i64: 1, 8, 64>}]} {
    %c0 = arith.constant 0 : index
    %c0_0 = arith.constant 0 : index
    %c0_1 = arith.constant 0 : index
    %0 = vector.load %arg2[%c0, %c0_0, %c0_1] : memref<1x8x32xf32, #tpu.memory_space<vmem>>, vector<1x8x32xf32>
    %1 = vector.shape_cast %0 : vector<1x8x32xf32> to vector<8x32xf32>
    %c0_2 = arith.constant 0 : index
    %c0_3 = arith.constant 0 : index
    %2 = vector.load %arg3[%c0_2, %c0_3] : memref<1x32xf32, #tpu.memory_space<vmem>>, vector<1x32xf32>
    %c0_4 = arith.constant 0 : index
    %c0_5 = arith.constant 0 : index
    %3 = vector.load %arg4[%c0_4, %c0_5] : memref<1x32xf32, #tpu.memory_space<vmem>>, vector<1x32xf32>
    %cst = arith.constant dense<0.000000e+00> : vector<8xf32>
    %4 = vector.multi_reduction <add>, %1, %cst [1] : vector<8x32xf32> to vector<8xf32>
    %5 = vector.shape_cast %4 : vector<8xf32> to vector<8x1xf32>
    %cst_6 = arith.constant 3.200000e+01 : f32
    %6 = vector.broadcast %cst_6 : f32 to vector<8x1xf32>
    %7 = arith.divf %5, %6 : vector<8x1xf32>
    %8 = vector.broadcast %7 : vector<8x1xf32> to vector<8x32xf32>
    %9 = arith.subf %1, %8 : vector<8x32xf32>
    %10 = arith.mulf %9, %9 : vector<8x32xf32>
    %cst_7 = arith.constant dense<0.000000e+00> : vector<8xf32>
    %11 = vector.multi_reduction <add>, %10, %cst_7 [1] : vector<8x32xf32> to vector<8xf32>
    %12 = vector.shape_cast %11 : vector<8xf32> to vector<8x1xf32>
    %cst_8 = arith.constant 3.200000e+01 : f32
    %13 = vector.broadcast %cst_8 : f32 to vector<8x1xf32>
    %14 = arith.divf %12, %13 : vector<8x1xf32>
    %15 = vector.broadcast %7 : vector<8x1xf32> to vector<8x32xf32>
    %16 = arith.subf %1, %15 : vector<8x32xf32>
    %cst_9 = arith.constant 9.99999974E-6 : f32
    %17 = vector.broadcast %cst_9 : f32 to vector<8x1xf32>
    %18 = arith.addf %14, %17 : vector<8x1xf32>
    %19 = math.rsqrt %18 : vector<8x1xf32>
    %20 = vector.broadcast %19 : vector<8x1xf32> to vector<8x32xf32>
    %21 = arith.mulf %16, %20 : vector<8x32xf32>
    %22 = vector.broadcast %2 : vector<1x32xf32> to vector<8x32xf32>
    %23 = arith.mulf %21, %22 : vector<8x32xf32>
    %24 = vector.broadcast %3 : vector<1x32xf32> to vector<8x32xf32>
    %25 = arith.addf %23, %24 : vector<8x32xf32>
    %26 = arith.truncf %25 : vector<8x32xf32> to vector<8x32xbf16>
    %c0_10 = arith.constant 0 : index
    %c0_11 = arith.constant 0 : index
    %27 = vector.load %arg5[%c0_10, %c0_11] : memref<32x64xbf16, #tpu.memory_space<vmem>>, vector<32x64xbf16>
    %cst_12 = arith.constant dense<0.000000e+00> : vector<8x64xf32>
    %28 = tpu.matmul %26, %27, %cst_12 {dimension_numbers = #tpu.dot_dimension_numbers<[1], [0], [0], [1], [0, 0, 1, 1], [], []>} : vector<8x32xbf16>, vector<32x64xbf16>, vector<8x64xf32> -> vector<8x64xf32>
    %c0_13 = arith.constant 0 : index
    %c0_14 = arith.constant 0 : index
    %29 = vector.load %arg6[%c0_13, %c0_14] : memref<1x64xf32, #tpu.memory_space<vmem>>, vector<1x64xf32>
    %30 = vector.broadcast %29 : vector<1x64xf32> to vector<8x64xf32>
    %31 = arith.addf %28, %30 : vector<8x64xf32>
    %32 = arith.truncf %31 : vector<8x64xf32> to vector<8x64xbf16>
    %c0_15 = arith.constant 0 : index
    %c0_16 = arith.constant 0 : index
    %c0_17 = arith.constant 0 : index
    %33 = vector.load %arg7[%c0_15, %c0_16, %c0_17] : memref<1x8x64xbf16, #tpu.memory_space<vmem>>, vector<1x8x64xbf16>
    %34 = vector.shape_cast %33 : vector<1x8x64xbf16> to vector<8x64xbf16>
    %35 = vector.shape_cast %32 : vector<8x64xbf16> to vector<1x8x64xbf16>
    tpu.vector_store %arg7[%c0_15, %c0_16, %c0_17], %35 {strides = array<i32>} : memref<1x8x64xbf16, #tpu.memory_space<vmem>>, vector<1x8x64xbf16>,
    return
  }
  func.func @transform_0(%arg0: i32, %arg1: i32) -> (i32, i32, i32) {
    %c0_i32 = arith.constant 0 : i32
    %c0_i32_0 = arith.constant 0 : i32
    return %arg0, %arg1, %c0_i32 : i32, i32, i32
  }
  func.func @transform_1(%arg0: i32, %arg1: i32) -> (i32, i32) {
    %c0_i32 = arith.constant 0 : i32
    %c0_i32_0 = arith.constant 0 : i32
    %c0_i32_1 = arith.constant 0 : i32
    return %c0_i32, %c0_i32_0 : i32, i32
  }
  func.func @transform_2(%arg0: i32, %arg1: i32) -> (i32, i32) {
    %c0_i32 = arith.constant 0 : i32
    %c0_i32_0 = arith.constant 0 : i32
    %c0_i32_1 = arith.constant 0 : i32
    return %c0_i32, %c0_i32_0 : i32, i32
  }
  func.func @transform_3(%arg0: i32, %arg1: i32) -> (i32, i32) {
    %c0_i32 = arith.constant 0 : i32
    %c0_i32_0 = arith.constant 0 : i32
    %c0_i32_1 = arith.constant 0 : i32
    return %c0_i32, %c0_i32_0 : i32, i32
  }
  func.func @transform_4(%arg0: i32, %arg1: i32) -> (i32, i32) {
    %c0_i32 = arith.constant 0 : i32
    %c0_i32_0 = arith.constant 0 : i32
    %c0_i32_1 = arith.constant 0 : i32
    return %c0_i32, %c0_i32_0 : i32, i32
  }
  func.func @transform_5(%arg0: i32, %arg1: i32) -> (i32, i32, i32) {
    %c0_i32 = arith.constant 0 : i32
    %c0_i32_0 = arith.constant 0 : i32
    return %arg0, %arg1, %c0_i32 : i32, i32, i32
  }
}

module attributes {stable_mosaic.version = 11 : i64} {
  func.func @_kv_prepass_kernel(%arg0: i32, %arg1: i32, %arg2: memref<1x8x32xf32, #tpu.memory_space<vmem>>, %arg3: memref<1x32xf32, #tpu.memory_space<vmem>>, %arg4: memref<1x32xf32, #tpu.memory_space<vmem>>, %arg5: memref<32x64xbf16, #tpu.memory_space<vmem>>, %arg6: memref<1x64xf32, #tpu.memory_space<vmem>>, %arg7: memref<1x8x64xbf16, #tpu.memory_space<vmem>>) attributes {dimension_semantics = [#tpu.dimension_semantics<parallel>, #tpu.dimension_semantics<parallel>], iteration_bounds = array<i64: 2, 1>, scalar_prefetch = 0 : i64, scratch_operands = 0 : i64, tpu.core_type = #tpu.core_type<tc>, window_params = [{transform_indices = @transform_0, window_bounds = array<i64: 1, 8, 32>}, {pipeline_mode = #tpu.pipeline_mode<synchronous>, transform_indices = @transform_1, window_bounds = array<i64: 1, 32>}, {pipeline_mode = #tpu.pipeline_mode<synchronous>, transform_indices = @transform_2, window_bounds = array<i64: 1, 32>}, {pipeline_mode = #tpu.pipeline_mode<synchronous>, transform_indices = @transform_3, window_bounds = array<i64: 32, 64>}, {pipeline_mode = #tpu.pipeline_mode<synchronous>, transform_indices = @transform_4, window_bounds = array<i64: 1, 64>}, {transform_indices = @transform_5, window_bounds = array<i64: 1, 8, 64>}]} {
    %c0 = arith.constant 0 : index
    %c0_0 = arith.constant 0 : index
    %c0_1 = arith.constant 0 : index
    %0 = vector.load %arg2[%c0, %c0_0, %c0_1] : memref<1x8x32xf32, #tpu.memory_space<vmem>>, vector<1x8x32xf32>
    %1 = vector.shape_cast %0 : vector<1x8x32xf32> to vector<8x32xf32>
    %c0_2 = arith.constant 0 : index
    %c0_3 = arith.constant 0 : index
    %2 = vector.load %arg3[%c0_2, %c0_3] : memref<1x32xf32, #tpu.memory_space<vmem>>, vector<1x32xf32>
    %c0_4 = arith.constant 0 : index
    %c0_5 = arith.constant 0 : index
    %3 = vector.load %arg4[%c0_4, %c0_5] : memref<1x32xf32, #tpu.memory_space<vmem>>, vector<1x32xf32>
    %cst = arith.constant dense<0.000000e+00> : vector<8xf32>
    %4 = vector.multi_reduction <add>, %1, %cst [1] : vector<8x32xf32> to vector<8xf32>
    %5 = vector.shape_cast %4 : vector<8xf32> to vector<8x1xf32>
    %cst_6 = arith.constant 3.200000e+01 : f32
    %6 = vector.broadcast %cst_6 : f32 to vector<8x1xf32>
    %7 = arith.divf %5, %6 : vector<8x1xf32>
    %8 = vector.broadcast %7 : vector<8x1xf32> to vector<8x32xf32>
    %9 = arith.subf %1, %8 : vector<8x32xf32>
    %10 = arith.mulf %9, %9 : vector<8x32xf32>
    %cst_7 = arith.constant dense<0.000000e+00> : vector<8xf32>
    %11 = vector.multi_reduction <add>, %10, %cst_7 [1] : vector<8x32xf32> to vector<8xf32>
    %12 = vector.shape_cast %11 : vector<8xf32> to vector<8x1xf32>
    %cst_8 = arith.constant 3.200000e+01 : f32
    %13 = vector.broadcast %cst_8 : f32 to vector<8x1xf32>
    %14 = arith.divf %12, %13 : vector<8x1xf32>
    %15 = vector.broadcast %7 : vector<8x1xf32> to vector<8x32xf32>
    %16 = arith.subf %1, %15 : vector<8x32xf32>
    %cst_9 = arith.constant 9.99999974E-6 : f32
    %17 = vector.broadcast %cst_9 : f32 to vector<8x1xf32>
    %18 = arith.addf %14, %17 : vector<8x1xf32>
    %19 = math.rsqrt %18 : vector<8x1xf32>
    %20 = vector.broadcast %19 : vector<8x1xf32> to vector<8x32xf32>
    %21 = arith.mulf %16, %20 : vector<8x32xf32>
    %22 = vector.broadcast %2 : vector<1x32xf32> to vector<8x32xf32>
    %23 = arith.mulf %21, %22 : vector<8x32xf32>
    %24 = vector.broadcast %3 : vector<1x32xf32> to vector<8x32xf32>
    %25 = arith.addf %23, %24 : vector<8x32xf32>
    %26 = arith.truncf %25 : vector<8x32xf32> to vector<8x32xbf16>
    %c0_10 = arith.constant 0 : index
    %c0_11 = arith.constant 0 : index
    %27 = vector.load %arg5[%c0_10, %c0_11] : memref<32x64xbf16, #tpu.memory_space<vmem>>, vector<32x64xbf16>
    %cst_12 = arith.constant dense<0.000000e+00> : vector<8x64xf32>
    %28 = tpu.matmul %26, %27, %cst_12 {dimension_numbers = #tpu.dot_dimension_numbers<[1], [0], [0], [1], [0, 0, 1, 1], [], []>} : vector<8x32xbf16>, vector<32x64xbf16>, vector<8x64xf32> -> vector<8x64xf32>
    %c0_13 = arith.constant 0 : index
    %c0_14 = arith.constant 0 : index
    %29 = vector.load %arg6[%c0_13, %c0_14] : memref<1x64xf32, #tpu.memory_space<vmem>>, vector<1x64xf32>
    %30 = vector.broadcast %29 : vector<1x64xf32> to vector<8x64xf32>
    %31 = arith.addf %28, %30 : vector<8x64xf32>
    %32 = arith.truncf %31 : vector<8x64xf32> to vector<8x64xbf16>
    %c0_15 = arith.constant 0 : index
    %c0_16 = arith.constant 0 : index
    %c0_17 = arith.constant 0 : index
    %33 = vector.load %arg7[%c0_15, %c0_16, %c0_17] : memref<1x8x64xbf16, #tpu.memory_space<vmem>>, vector<1x8x64xbf16>
    %34 = vector.shape_cast %33 : vector<1x8x64xbf16> to vector<8x64xbf16>
    %35 = vector.shape_cast %32 : vector<8x64xbf16> to vector<1x8x64xbf16>
    tpu.vector_store %arg7[%c0_15, %c0_16, %c0_17], %35 {strides = array<i32>} : memref<1x8x64xbf16, #tpu.memory_space<vmem>>, vector<1x8x64xbf16>,
    return
  }
  func.func @transform_0(%arg0: i32, %arg1: i32) -> (i32, i32, i32) {
    %c0_i32 = arith.constant 0 : i32
    %c0_i32_0 = arith.constant 0 : i32
    return %arg0, %arg1, %c0_i32 : i32, i32, i32
  }
  func.func @transform_1(%arg0: i32, %arg1: i32) -> (i32, i32) {
    %c0_i32 = arith.constant 0 : i32
    %c0_i32_0 = arith.constant 0 : i32
    %c0_i32_1 = arith.constant 0 : i32
    return %c0_i32, %c0_i32_0 : i32, i32
  }
  func.func @transform_2(%arg0: i32, %arg1: i32) -> (i32, i32) {
    %c0_i32 = arith.constant 0 : i32
    %c0_i32_0 = arith.constant 0 : i32
    %c0_i32_1 = arith.constant 0 : i32
    return %c0_i32, %c0_i32_0 : i32, i32
  }
  func.func @transform_3(%arg0: i32, %arg1: i32) -> (i32, i32) {
    %c0_i32 = arith.constant 0 : i32
    %c0_i32_0 = arith.constant 0 : i32
    %c0_i32_1 = arith.constant 0 : i32
    return %c0_i32, %c0_i32_0 : i32, i32
  }
  func.func @transform_4(%arg0: i32, %arg1: i32) -> (i32, i32) {
    %c0_i32 = arith.constant 0 : i32
    %c0_i32_0 = arith.constant 0 : i32
    %c0_i32_1 = arith.constant 0 : i32
    return %c0_i32, %c0_i32_0 : i32, i32
  }
  func.func @transform_5(%arg0: i32, %arg1: i32) -> (i32, i32, i32) {
    %c0_i32 = arith.constant 0 : i32
    %c0_i32_0 = arith.constant 0 : i32
    return %arg0, %arg1, %c0_i32 : i32, i32, i32
  }
}

</mosaic_0001>

<bundles_post_ra>
// kernel: tpu_custom_call.1
= control target key start
LH: loop header
LB: loop body
LE: loop exit
PB: predicated region body
PF: predicated region fallthrough
CT: control target
= control target key end

     0   :  { %10 = vsyncpa [#allocation3], 0  ;;  %s1003_s0 = inlined_call_operand.hbm [shape: f32[2,8,32], index: 0, kind: input, shape index: {}]   ;;  %s1004_s1 = inlined_call_operand.vmem [shape: f32[1,32], index: 1, kind: input, shape index: {}]   ;;  %s1005_s2 = inlined_call_operand.vmem [shape: f32[1,32], index: 2, kind: input, shape index: {}]   ;;  %s1006_s3 = inlined_call_operand.hbm [shape: bf16[32,64], index: 3, kind: input, shape index: {}]   ;;  %s1007_s4 = inlined_call_operand.vmem [shape: f32[1,64], index: 4, kind: input, shape index: {}]   ;;  %s1008_s5 = inlined_call_operand.hbm [shape: bf16[2,8,64], index: 5, kind: output, shape index: {}]  }
   0x1   :  { %12 = vsyncpa [#allocation3 + $0x1], 0 }
   0x2   :  { %13 = vsyncpa [#allocation6], 0 }
   0x3   :  { %14 = vsyncpa [#allocation4], 0 }
   0x4   :  { %16 = vsyncpa [#allocation4 + $0x1], 0  ;;  %s776_s18 = smov 0   ;;  %s778_s19 = smov 0  }
   0x5   :  { %s780_s20 = smov 0   ;;  %s782_s21 = smov 0  }
   0x6   :  { %s784_s22 = smov 0   ;;  %s786_s23 = smov 0  }
   0x7 LB: > { %s480_s24 = sadd.s32 4294967295, %s737_s23   ;;  %s481_s25 = sadd.s32 4294967294, %s737_s23   ;;  %s737_s23 = sphi %s786_s23, %s22_s23   ;;  %s733_s22 = sphi %s784_s22, %s1032_s22   ;;  %s729_s21 = sphi %s782_s21, %s1031_s21   ;;  %s725_s20 = sphi %s780_s20, %s1030_s20   ;;  %s721_s19 = sphi %s778_s19, %s1029_s19   ;;  %s717_s18 = sphi %s776_s18, %s1028_s18  }
   0x8   : > { %p56_p0 = scmp.ne.s32.totalorder %s721_s19, %s717_s18  ;;  %p810_p1 = scmp.eq.s32.totalorder %s480_s24, 0 }
   0x9   : > { %p814_p2 = scmp.eq.s32.totalorder %s480_s24, 1  ;;  %p172_p3 = scmp.eq.s32.totalorder %s481_s25, 1 }
   0xa   : > { %s1013_s26 = scalar_select %p810_p1, 1, 0 }
   0xb   : > { %s1014_s27 = scalar_select %p814_p2, 1, 0 }
   0xc   : > { %p820_p4 = por %p810_p1, %p56_p0  ;;  %p482_p5 = scmp.ge.s32.totalorder %s737_s23, 1 }
   0xd   : > { %p825_p6 = por %p172_p3, %p56_p0  ;;  %p179_p7 = scmp.lt.s32.totalorder %s737_s23, 3 }
   0xe   : > { %s1015_s28 = scalar_select %p820_p4, 1, 0 }
   0xf   : > { %s1016_s29 = scalar_select %p825_p6, 1, 0 }
  0x10   : > { %p830_p8 = pnand %p482_p5, %p179_p7  ;;  %s739_s6 = smov [#allocation5]  }
  0x11   : > { %s197_s7 = sshll.u32 %s739_s6, 4  ;;  %s34_s9 = sadd.s32 1, %s733_s22  ;;  %s198_s7 = int_to_ptr.vmem [resolvable:$true] %s197_s7 }
  0x12   : > { %s1017_s30 = scalar_select %p830_p8, 1, 0 }
  0x13   : > { %p520_p9 = pneg %p830_p8  ;;  %s593_s12 = scalar_lea.hbm %s1006_s3, 256 }
  0x14   : > { %p594_p12 = scmp.ne.s32.totalorder %s1006_s3, %s593_s12  ;;  %p600_p5 = scmp.lt.u32.totalorder %s593_s12, %s1006_s3 }
  0x15   : > { %p839_p11 = pnand %p520_p9, %p810_p1 }
  0x17   : > { %p595_p13 = pneg %p839_p11 }
  0x19   : > { %p596_p0 = pnand %p595_p13, %p594_p12 }
  0x1b   : > { %p597_p3 = pneg %p596_p0 }
  0x1d   : > { %p602_p7 = pnand %p600_p5, %p597_p3 }
  0x1f   : > { %605 = shalt.err (!%p602_p7)
}
  0x20   : > { %s606_s17 = scalar_lea.vmem %s198_s7, 256  ;;  %p614_p1 = scmp.lt.s32.totalorder %s198_s7, %s198_s7 }
  0x21   : > { %p607_p9 = scmp.ne.s32.totalorder %s198_s7, %s606_s17  ;;  %p615_p4 = scmp.lt.s32.totalorder %s606_s17, %s606_s17 }
  0x23   : > { %p609_p10 = pnand %p607_p9, %p595_p13  ;;  %p616_p8 = por %p615_p4, %p614_p1 }
  0x25   : > { %p610_p6 = pneg %p609_p10 }
  0x27   : > { %p617_p2 = pnand %p616_p8, %p610_p6 }
  0x29   : > { %620 = shalt.err (!%p617_p2)
}
  0x2a   : > { %s740_s24 = smov 64   ;;  %s741_s25 = smov 4  }
  0x2b   : > { %523 = dma.hbm_to_vmem [thread:$0]  (!%p839_p11), %s1006_s3, 256, %s198_s7, [#allocation6], %s740_s24, %s740_s24, %s741_s25  }
  0x2c   : > { %p36_p1 = scmp.ge.s32.totalorder %s34_s9, 2  ;;  %s43_s11 = sadd.s32 1, %s725_s20 }
  0x2d   : > { %p50_p2 = scmp.ne.s32.totalorder %s725_s20, %s721_s19  ;;  %p51_p4 = scmp.eq.s32.totalorder %s737_s23, 0 }
  0x2e   : > { %s1034_s9 = smov (%p36_p1, %s34_s9), 0  ;;  %p1020_p8 = scmp.ne.s32.totalorder %s1014_s27, 0 }
  0x2f   : > { %p866_p6 = por %p51_p4, %p50_p2  ;;  %s38_s8 = ssub.s32 %s733_s22, %s1034_s9 }
  0x30   : > { %p872_p10 = por %p1020_p8, %p50_p2  ;;  %p533_p12 = scmp.lt.s32.totalorder %s737_s23, 2 }
  0x31   : > { %p41_p11 = scmp.eq.s32.totalorder %s38_s8, 0  ;;  %s214_s7 = sand.u32 1, %s725_s20  }
  0x32   : > { %s485_s14 = sshll.u32 %s214_s7, 3  ;;  %s486_s16 = sshll.u32 %s733_s22, 7 }
  0x33   : > { %s881_s15 = scalar_select %p41_p11, %s725_s20, %s43_s11  }
  0x34   : > { %s887_s25 = scalar_lea.hbm %s1003_s0, %s486_s16  ;;  %s218_s27 = scalar_lea.vmem [#allocation2], %s485_s14 }
  0x35   : > { %s226_s6 = sshll.u32 %s218_s27, 4  ;;  %p893_p13 = pnand %p533_p12, %p866_p6  ;;  %s889_s6 = int_to_ptr.vmem [resolvable:$true] %s226_s6 }
  0x36   : > { %s215_s11 = scalar_lea.sflag [#allocation3], %s214_s7  ;;  %s621_s8 = scalar_lea.hbm %s887_s25, 128 }
  0x37   : > { %p622_p0 = scmp.ne.s32.totalorder %s887_s25, %s621_s8  ;;  %p623_p3 = pneg %p893_p13 }
  0x38   : > { %s626_s17 = scalar_lea.hbm %s1003_s0, 256  ;;  %p627_p9 = scmp.lt.u32.totalorder %s887_s25, %s1003_s0 }
  0x39   : > { %p624_p5 = pnand %p623_p3, %p622_p0  ;;  %p628_p1 = scmp.lt.u32.totalorder %s626_s17, %s621_s8 }
  0x3a   : > { %p630_p4 = scmp.lt.u32.totalorder %s621_s8, %s887_s25 }
  0x3b   : > { %p625_p7 = pneg %p624_p5  ;;  %p629_p2 = por %p628_p1, %p627_p9 }
  0x3d   : > { %p631_p6 = por %p630_p4, %p629_p2 }
  0x3f   : > { %p632_p8 = pnand %p631_p6, %p625_p7 }
  0x41   : > { %635 = shalt.err (!%p632_p8)
}
  0x42   : > { %s636_s7 = scalar_lea.vmem %s889_s6, 128  ;;  %s742_s27 = smov [#allocation2]  }
  0x43   : > { %p637_p12 = scmp.ne.s32.totalorder %s889_s6, %s636_s7  ;;  %s641_s14 = sshll.u32 %s742_s27, 4  ;;  %s642_s14 = int_to_ptr.vmem [resolvable:$false] %s641_s14 }
  0x44   : > { %s643_s16 = scalar_lea.vmem %s642_s14, 256  ;;  %p644_p5 = scmp.lt.s32.totalorder %s889_s6, %s642_s14 }
  0x45   : > { %p639_p11 = pnand %p637_p12, %p623_p3  ;;  %p645_p9 = scmp.lt.s32.totalorder %s643_s16, %s636_s7 }
  0x47   : > { %p640_p0 = pneg %p639_p11  ;;  %p646_p1 = por %p645_p9, %p644_p5 }
  0x49   : > { %p647_p2 = pnand %p646_p1, %p640_p0 }
  0x4b   : > { %650 = shalt.err (!%p647_p2)
}
  0x4c   : > { %527 = dma.hbm_to_vmem [thread:$0]  (!%p893_p13), %s887_s25, 128, %s889_s6, %s215_s11  }
  0x4d   : > { %p1023_p7 = scmp.ne.s32.totalorder %s1017_s30, 0 }
  0x4e   : > { %s925_s8 = sand.u32 (!%p1023_p7), 1, %s721_s19   ;;  %p1024_p3 = scmp.ne.s32.totalorder (!%p1023_p7), %s1015_s28, 0 }
  0x4f   : > { %235 = sbr.rel (%p1023_p7) target bundleno = 636 (0x27c), region = 40  ;;  %s488_s17 = sshll.u32 (!%p1023_p7), %s925_s8, 3 }
  0x50   : > { %s238_s12 = scalar_lea.sflag (!%p1023_p7), [#allocation3], %s925_s8  ;;  %s241_s24 = scalar_lea.vmem (!%p1023_p7), [#allocation2], %s488_s17 }
  0x56   : > { %704 = dma.done.wait (%p1024_p3), %s238_s12, 128  }
  0x57   : > { %706 = vsyncadd (%p1024_p3), %s238_s12, 4294967168  ;;  %p1025_p4 = scmp.ne.s32.totalorder %s1013_s26, 0 }
  0x59   : > { %708 = dma.done.wait (%p1025_p4), [#allocation6], 256  }
  0x5a   : > { %710 = vsyncadd (%p1025_p4), [#allocation6], 4294967040  ;;  %vm276_vm0 = vcmask 261120   ;;  %v273_v0 = vld [vmem:[%s241_s24] sm:$0xff]  ;;  %v589_v7 = vld [vmem:[#allocation5] sm:$0xff]   ;;  %v743_v8 = vmov 0.0  }
  0x5b   : > { %v277_v1 = vsel %vm276_vm0, %v273_v0, 0.0  ;;  %504 = vmatprep.subr.bf16.mxu0 %v743_v8  ;;  %v590_v9 = vld [vmem:[#allocation5 + $0x8] sm:$0xff]   ;;  %vm744_vm1 = vmmov 0   ;;  %v491_v14 = vld [vmem:[%s1004_s1] ss:$0 sm:$0xff]  ;;  %s490_s6 = sshll.u32 %s925_s8, 2 }
  0x5c   : > { %278 = vadd.xlane.f32.xlu0 %v277_v1  ;;  %505 = vmatpush3.bf16.msra.mxu0 %v589_v7  ;;  %v492_v16 = vld [vmem:[%s1005_s2] ss:$0 sm:$0xff]  ;;  %s498_s7 = sshll.u32 %s729_s21, 6  ;;  %s271_s27 = scalar_lea.vmem [#allocation7], %s490_s6  ;;  %vm373_vm2 = vcmask 519168  }
  0x5d   : > { %508 = vmatprep.mubr.msk.bf16.mxu0 %vm744_vm1, %v743_v8  ;;  %506 = vmatprep.subr.bf16.mxu0 %v743_v8  ;;  %v493_v20 = vld [vmem:[%s1007_s4] ss:$0 sm:$0xff]  ;;  %s390_s14 = sshll.u32 %s271_s27, 4  ;;  %s954_s12 = scalar_lea.hbm %s1008_s5, %s498_s7  ;;  %s956_s14 = int_to_ptr.vmem [resolvable:$true] %s390_s14 }
  0x5e   : > { %s376_s21 = scalar_lea.sflag [#allocation4], %s925_s8  ;;  %s651_s24 = scalar_lea.vmem %s956_s14, 64 }
  0x5f   : > { %p652_p13 = scmp.ne.s32.totalorder %s956_s14, %s651_s24  ;;  %s745_s26 = smov [#allocation7]  }
  0x60   : > { %507 = vmatpush3.bf16.msra.mxu0 %v590_v9  ;;  %s655_s28 = sshll.u32 %s745_s26, 4  ;;  %s656_s28 = int_to_ptr.vmem [resolvable:$false] %s655_s28 }
  0x61   : > { %p653_p6 = pnand %p652_p13, %p872_p10  ;;  %s657_s30 = scalar_lea.vmem %s656_s28, 128 }
  0x62   : > { %p658_p12 = scmp.lt.s32.totalorder %s956_s14, %s656_s28  ;;  %p659_p11 = scmp.lt.s32.totalorder %s657_s30, %s651_s24 }
  0x63   : > { %p654_p8 = pneg %p653_p6 }
  0x64   : > { %p660_p0 = por %p659_p11, %p658_p12 }
  0x66   : > { %p661_p5 = pnand %p660_p0, %p654_p8 }
  0xe9   : > { %v279_v2 = vpop.xlane.xlu0 %278 }
  0xea   : > { %v281_v3 = vmul.f32 0.03125, %v279_v2 }
  0xec   : > { %v282_v4 = vsub.f32 %v273_v0, %v281_v3 }
  0xee   : > { %v283_v5 = vmul.f32 %v282_v4, %v282_v4 }
  0xf0   : > { %v284_v6 = vsel %vm276_vm0, %v283_v5, 0.0 }
  0xf1   : > { %285 = vadd.xlane.f32.xlu0 %v284_v6 }
 0x17e   : > { %v286_v10 = vpop.xlane.xlu0 %285 }
 0x17f   : > { %v287_v11 = vmul.f32 0.03125, %v286_v10 }
 0x181   : > { %v288_v12 = vadd.f32 1e-05, %v287_v11 }
 0x183   : > { %591 = vrsqrt.f32 %v288_v12 }
 0x18d   : > { %v592_v13 = vpop.eup %591 }
 0x18e   : > { %v290_v15 = vmul.f32 %v592_v13, %v282_v4 }
 0x190   : > { %v297_v17 = vmul.f32 %v491_v14, %v290_v15 }
 0x192   : > { %v304_v18 = vadd.f32 %v492_v16, %v297_v17 }
 0x194   : > { %v305_v19 = vpack.c.bf16 %v304_v18, %v304_v18 }
 0x196   : > { %509 = vmatmul.mubr.msk.bf16.vlgmr.msra.gmra.mrb[0].mxu0 %vm276_vm0, %v305_v19 }
 0x269   : > { %v366_v21 = vpop.f32.mrb[0].mxu0 }
 0x26a   : > { %v367_v22 = vadd.f32 %v493_v20, %v366_v21  ;;  %v510_v23 = vpop.f32.mrb[1].mxu0 }
 0x26b   : > { %v369_v24 = vpop.f32.mrb[2].mxu0 }
 0x26c   : > { %v372_v25 = vpack.c.bf16 %v367_v22, %v367_v22  ;;  %v511_v26 = vpop.f32.mrb[3].mxu0 }
 0x26e   : > { %374 = vst.msk [vmem:[%s271_s27] sm:$0xf] %vm373_vm2, %v372_v25 }
 0x26f   : > { %664 = shalt.err (!%p661_p5)
}
 0x270   : > { %s665_s8 = scalar_lea.hbm %s954_s12, 64  ;;  %s669_s10 = scalar_lea.hbm %s1008_s5, 128 }
 0x271   : > { %p666_p9 = scmp.ne.s32.totalorder %s954_s12, %s665_s8  ;;  %p670_p7 = scmp.lt.u32.totalorder %s954_s12, %s1008_s5 }
 0x272   : > { %p671_p3 = scmp.lt.u32.totalorder %s669_s10, %s665_s8  ;;  %p673_p13 = scmp.lt.u32.totalorder %s665_s8, %s954_s12 }
 0x273   : > { %p667_p1 = pnand %p666_p9, %p872_p10 }
 0x274   : > { %p672_p4 = por %p671_p3, %p670_p7 }
 0x275   : > { %p668_p2 = pneg %p667_p1 }
 0x276   : > { %p674_p6 = por %p673_p13, %p672_p4 }
 0x278   : > { %p675_p8 = pnand %p674_p6, %p668_p2 }
 0x27a   : > { %678 = shalt.err (!%p675_p8)
}
 0x27b   : > { %518 = dma.vmem_to_hbm [thread:$0]  (%p872_p10), %s956_s14, 64, %s954_s12, %s376_s21  }
 0x27c PF: > { %s402_s27 = sand.u32 1, %s717_s18   ;;  %p1026_p12 = scmp.ne.s32.totalorder %s1016_s29, 0 }
 0x27d   : > { %p1027_p11 = scmp.ge.s32.totalorder %s737_s23, 2  ;;  %s403_s16 = scalar_lea.sflag [#allocation4], %s402_s27 }
 0x27f   : > { %p529_p0 = pnand %p1027_p11, %p1026_p12 }
 0x281   : > { %712 = dma.done.wait (!%p529_p0), %s403_s16, 64  }
 0x282   : > { %714 = vsyncadd (!%p529_p0), %s403_s16, 4294967232  ;;  %s22_s23 = sadd.s32 1, %s737_s23   ;;  %s1028_s18 = smov %s721_s19 }
 0x283   : > { %p19_p5 = scmp.ge.s32.totalorder %s22_s23, 4   ;;  %s1029_s19 = smov %s725_s20 }
 0x284   : > { %s1030_s20 = smov %s881_s15  ;;  %s1031_s21 = smov %s733_s22 }
 0x285   : > { %s1032_s22 = smov %s1034_s9  ;;  %21 = sbr.rel (!%p19_p5) target bundleno = 7 (0x7), region = 89 }
 0x28c   :  { %408 = vsyncpa [#allocation3], 1 }
 0x28d   :  { %410 = vsyncpa [#allocation3 + $0x1], 1 }
 0x28e   :  { %411 = vsyncpa [#allocation6], 1 }
 0x28f   :  { %412 = vsyncpa [#allocation4], 1 }
 0x290   :  { %414 = vsyncpa [#allocation4 + $0x1], 1 }

// kernel: tpu_custom_call.1
= control target key start
LH: loop header
LB: loop body
LE: loop exit
PB: predicated region body
PF: predicated region fallthrough
CT: control target
= control target key end

     0   :  { %10 = vsyncpa [#allocation3], 0  ;;  %s1003_s0 = inlined_call_operand.hbm [shape: f32[2,8,32], index: 0, kind: input, shape index: {}]   ;;  %s1004_s1 = inlined_call_operand.vmem [shape: f32[1,32], index: 1, kind: input, shape index: {}]   ;;  %s1005_s2 = inlined_call_operand.vmem [shape: f32[1,32], index: 2, kind: input, shape index: {}]   ;;  %s1006_s3 = inlined_call_operand.hbm [shape: bf16[32,64], index: 3, kind: input, shape index: {}]   ;;  %s1007_s4 = inlined_call_operand.vmem [shape: f32[1,64], index: 4, kind: input, shape index: {}]   ;;  %s1008_s5 = inlined_call_operand.hbm [shape: bf16[2,8,64], index: 5, kind: output, shape index: {}]  }
   0x1   :  { %12 = vsyncpa [#allocation3 + $0x1], 0 }
   0x2   :  { %13 = vsyncpa [#allocation6], 0 }
   0x3   :  { %14 = vsyncpa [#allocation4], 0 }
   0x4   :  { %16 = vsyncpa [#allocation4 + $0x1], 0  ;;  %s776_s18 = smov 0   ;;  %s778_s19 = smov 0  }
   0x5   :  { %s780_s20 = smov 0   ;;  %s782_s21 = smov 0  }
   0x6   :  { %s784_s22 = smov 0   ;;  %s786_s23 = smov 0  }
   0x7 LB: > { %s480_s24 = sadd.s32 4294967295, %s737_s23   ;;  %s481_s25 = sadd.s32 4294967294, %s737_s23   ;;  %s737_s23 = sphi %s786_s23, %s22_s23   ;;  %s733_s22 = sphi %s784_s22, %s1032_s22   ;;  %s729_s21 = sphi %s782_s21, %s1031_s21   ;;  %s725_s20 = sphi %s780_s20, %s1030_s20   ;;  %s721_s19 = sphi %s778_s19, %s1029_s19   ;;  %s717_s18 = sphi %s776_s18, %s1028_s18  }
   0x8   : > { %p56_p0 = scmp.ne.s32.totalorder %s721_s19, %s717_s18  ;;  %p810_p1 = scmp.eq.s32.totalorder %s480_s24, 0 }
   0x9   : > { %p814_p2 = scmp.eq.s32.totalorder %s480_s24, 1  ;;  %p172_p3 = scmp.eq.s32.totalorder %s481_s25, 1 }
   0xa   : > { %s1013_s26 = scalar_select %p810_p1, 1, 0 }
   0xb   : > { %s1014_s27 = scalar_select %p814_p2, 1, 0 }
   0xc   : > { %p820_p4 = por %p810_p1, %p56_p0  ;;  %p482_p5 = scmp.ge.s32.totalorder %s737_s23, 1 }
   0xd   : > { %p825_p6 = por %p172_p3, %p56_p0  ;;  %p179_p7 = scmp.lt.s32.totalorder %s737_s23, 3 }
   0xe   : > { %s1015_s28 = scalar_select %p820_p4, 1, 0 }
   0xf   : > { %s1016_s29 = scalar_select %p825_p6, 1, 0 }
  0x10   : > { %p830_p8 = pnand %p482_p5, %p179_p7  ;;  %s739_s6 = smov [#allocation5]  }
  0x11   : > { %s197_s7 = sshll.u32 %s739_s6, 4  ;;  %s34_s9 = sadd.s32 1, %s733_s22  ;;  %s198_s7 = int_to_ptr.vmem [resolvable:$true] %s197_s7 }
  0x12   : > { %s1017_s30 = scalar_select %p830_p8, 1, 0 }
  0x13   : > { %p520_p9 = pneg %p830_p8  ;;  %s593_s12 = scalar_lea.hbm %s1006_s3, 256 }
  0x14   : > { %p594_p12 = scmp.ne.s32.totalorder %s1006_s3, %s593_s12  ;;  %p600_p5 = scmp.lt.u32.totalorder %s593_s12, %s1006_s3 }
  0x15   : > { %p839_p11 = pnand %p520_p9, %p810_p1 }
  0x17   : > { %p595_p13 = pneg %p839_p11 }
  0x19   : > { %p596_p0 = pnand %p595_p13, %p594_p12 }
  0x1b   : > { %p597_p3 = pneg %p596_p0 }
  0x1d   : > { %p602_p7 = pnand %p600_p5, %p597_p3 }
  0x1f   : > { %605 = shalt.err (!%p602_p7)
}
  0x20   : > { %s606_s17 = scalar_lea.vmem %s198_s7, 256  ;;  %p614_p1 = scmp.lt.s32.totalorder %s198_s7, %s198_s7 }
  0x21   : > { %p607_p9 = scmp.ne.s32.totalorder %s198_s7, %s606_s17  ;;  %p615_p4 = scmp.lt.s32.totalorder %s606_s17, %s606_s17 }
  0x23   : > { %p609_p10 = pnand %p607_p9, %p595_p13  ;;  %p616_p8 = por %p615_p4, %p614_p1 }
  0x25   : > { %p610_p6 = pneg %p609_p10 }
  0x27   : > { %p617_p2 = pnand %p616_p8, %p610_p6 }
  0x29   : > { %620 = shalt.err (!%p617_p2)
}
  0x2a   : > { %s740_s24 = smov 64   ;;  %s741_s25 = smov 4  }
  0x2b   : > { %523 = dma.hbm_to_vmem [thread:$0]  (!%p839_p11), %s1006_s3, 256, %s198_s7, [#allocation6], %s740_s24, %s740_s24, %s741_s25  }
  0x2c   : > { %p36_p1 = scmp.ge.s32.totalorder %s34_s9, 2  ;;  %s43_s11 = sadd.s32 1, %s725_s20 }
  0x2d   : > { %p50_p2 = scmp.ne.s32.totalorder %s725_s20, %s721_s19  ;;  %p51_p4 = scmp.eq.s32.totalorder %s737_s23, 0 }
  0x2e   : > { %s1034_s9 = smov (%p36_p1, %s34_s9), 0  ;;  %p1020_p8 = scmp.ne.s32.totalorder %s1014_s27, 0 }
  0x2f   : > { %p866_p6 = por %p51_p4, %p50_p2  ;;  %s38_s8 = ssub.s32 %s733_s22, %s1034_s9 }
  0x30   : > { %p872_p10 = por %p1020_p8, %p50_p2  ;;  %p533_p12 = scmp.lt.s32.totalorder %s737_s23, 2 }
  0x31   : > { %p41_p11 = scmp.eq.s32.totalorder %s38_s8, 0  ;;  %s214_s7 = sand.u32 1, %s725_s20  }
  0x32   : > { %s485_s14 = sshll.u32 %s214_s7, 3  ;;  %s486_s16 = sshll.u32 %s733_s22, 7 }
  0x33   : > { %s881_s15 = scalar_select %p41_p11, %s725_s20, %s43_s11  }
  0x34   : > { %s887_s25 = scalar_lea.hbm %s1003_s0, %s486_s16  ;;  %s218_s27 = scalar_lea.vmem [#allocation2], %s485_s14 }
  0x35   : > { %s226_s6 = sshll.u32 %s218_s27, 4  ;;  %p893_p13 = pnand %p533_p12, %p866_p6  ;;  %s889_s6 = int_to_ptr.vmem [resolvable:$true] %s226_s6 }
  0x36   : > { %s215_s11 = scalar_lea.sflag [#allocation3], %s214_s7  ;;  %s621_s8 = scalar_lea.hbm %s887_s25, 128 }
  0x37   : > { %p622_p0 = scmp.ne.s32.totalorder %s887_s25, %s621_s8  ;;  %p623_p3 = pneg %p893_p13 }
  0x38   : > { %s626_s17 = scalar_lea.hbm %s1003_s0, 256  ;;  %p627_p9 = scmp.lt.u32.totalorder %s887_s25, %s1003_s0 }
  0x39   : > { %p624_p5 = pnand %p623_p3, %p622_p0  ;;  %p628_p1 = scmp.lt.u32.totalorder %s626_s17, %s621_s8 }
  0x3a   : > { %p630_p4 = scmp.lt.u32.totalorder %s621_s8, %s887_s25 }
  0x3b   : > { %p625_p7 = pneg %p624_p5  ;;  %p629_p2 = por %p628_p1, %p627_p9 }
  0x3d   : > { %p631_p6 = por %p630_p4, %p629_p2 }
  0x3f   : > { %p632_p8 = pnand %p631_p6, %p625_p7 }
  0x41   : > { %635 = shalt.err (!%p632_p8)
}
  0x42   : > { %s636_s7 = scalar_lea.vmem %s889_s6, 128  ;;  %s742_s27 = smov [#allocation2]  }
  0x43   : > { %p637_p12 = scmp.ne.s32.totalorder %s889_s6, %s636_s7  ;;  %s641_s14 = sshll.u32 %s742_s27, 4  ;;  %s642_s14 = int_to_ptr.vmem [resolvable:$false] %s641_s14 }
  0x44   : > { %s643_s16 = scalar_lea.vmem %s642_s14, 256  ;;  %p644_p5 = scmp.lt.s32.totalorder %s889_s6, %s642_s14 }
  0x45   : > { %p639_p11 = pnand %p637_p12, %p623_p3  ;;  %p645_p9 = scmp.lt.s32.totalorder %s643_s16, %s636_s7 }
  0x47   : > { %p640_p0 = pneg %p639_p11  ;;  %p646_p1 = por %p645_p9, %p644_p5 }
  0x49   : > { %p647_p2 = pnand %p646_p1, %p640_p0 }
  0x4b   : > { %650 = shalt.err (!%p647_p2)
}
  0x4c   : > { %527 = dma.hbm_to_vmem [thread:$0]  (!%p893_p13), %s887_s25, 128, %s889_s6, %s215_s11  }
  0x4d   : > { %p1023_p7 = scmp.ne.s32.totalorder %s1017_s30, 0 }
  0x4e   : > { %s925_s8 = sand.u32 (!%p1023_p7), 1, %s721_s19   ;;  %p1024_p3 = scmp.ne.s32.totalorder (!%p1023_p7), %s1015_s28, 0 }
  0x4f   : > { %235 = sbr.rel (%p1023_p7) target bundleno = 636 (0x27c), region = 40  ;;  %s488_s17 = sshll.u32 (!%p1023_p7), %s925_s8, 3 }
  0x50   : > { %s238_s12 = scalar_lea.sflag (!%p1023_p7), [#allocation3], %s925_s8  ;;  %s241_s24 = scalar_lea.vmem (!%p1023_p7), [#allocation2], %s488_s17 }
  0x56   : > { %704 = dma.done.wait (%p1024_p3), %s238_s12, 128  }
  0x57   : > { %706 = vsyncadd (%p1024_p3), %s238_s12, 4294967168  ;;  %p1025_p4 = scmp.ne.s32.totalorder %s1013_s26, 0 }
  0x59   : > { %708 = dma.done.wait (%p1025_p4), [#allocation6], 256  }
  0x5a   : > { %710 = vsyncadd (%p1025_p4), [#allocation6], 4294967040  ;;  %vm276_vm0 = vcmask 261120   ;;  %v273_v0 = vld [vmem:[%s241_s24] sm:$0xff]  ;;  %v589_v7 = vld [vmem:[#allocation5] sm:$0xff]   ;;  %v743_v8 = vmov 0.0  }
  0x5b   : > { %v277_v1 = vsel %vm276_vm0, %v273_v0, 0.0  ;;  %504 = vmatprep.subr.bf16.mxu0 %v743_v8  ;;  %v590_v9 = vld [vmem:[#allocation5 + $0x8] sm:$0xff]   ;;  %vm744_vm1 = vmmov 0   ;;  %v491_v14 = vld [vmem:[%s1004_s1] ss:$0 sm:$0xff]  ;;  %s490_s6 = sshll.u32 %s925_s8, 2 }
  0x5c   : > { %278 = vadd.xlane.f32.xlu0 %v277_v1  ;;  %505 = vmatpush3.bf16.msra.mxu0 %v589_v7  ;;  %v492_v16 = vld [vmem:[%s1005_s2] ss:$0 sm:$0xff]  ;;  %s498_s7 = sshll.u32 %s729_s21, 6  ;;  %s271_s27 = scalar_lea.vmem [#allocation7], %s490_s6  ;;  %vm373_vm2 = vcmask 519168  }
  0x5d   : > { %508 = vmatprep.mubr.msk.bf16.mxu0 %vm744_vm1, %v743_v8  ;;  %506 = vmatprep.subr.bf16.mxu0 %v743_v8  ;;  %v493_v20 = vld [vmem:[%s1007_s4] ss:$0 sm:$0xff]  ;;  %s390_s14 = sshll.u32 %s271_s27, 4  ;;  %s954_s12 = scalar_lea.hbm %s1008_s5, %s498_s7  ;;  %s956_s14 = int_to_ptr.vmem [resolvable:$true] %s390_s14 }
  0x5e   : > { %s376_s21 = scalar_lea.sflag [#allocation4], %s925_s8  ;;  %s651_s24 = scalar_lea.vmem %s956_s14, 64 }
  0x5f   : > { %p652_p13 = scmp.ne.s32.totalorder %s956_s14, %s651_s24  ;;  %s745_s26 = smov [#allocation7]  }
  0x60   : > { %507 = vmatpush3.bf16.msra.mxu0 %v590_v9  ;;  %s655_s28 = sshll.u32 %s745_s26, 4  ;;  %s656_s28 = int_to_ptr.vmem [resolvable:$false] %s655_s28 }
  0x61   : > { %p653_p6 = pnand %p652_p13, %p872_p10  ;;  %s657_s30 = scalar_lea.vmem %s656_s28, 128 }
  0x62   : > { %p658_p12 = scmp.lt.s32.totalorder %s956_s14, %s656_s28  ;;  %p659_p11 = scmp.lt.s32.totalorder %s657_s30, %s651_s24 }
  0x63   : > { %p654_p8 = pneg %p653_p6 }
  0x64   : > { %p660_p0 = por %p659_p11, %p658_p12 }
  0x66   : > { %p661_p5 = pnand %p660_p0, %p654_p8 }
  0xe9   : > { %v279_v2 = vpop.xlane.xlu0 %278 }
  0xea   : > { %v281_v3 = vmul.f32 0.03125, %v279_v2 }
  0xec   : > { %v282_v4 = vsub.f32 %v273_v0, %v281_v3 }
  0xee   : > { %v283_v5 = vmul.f32 %v282_v4, %v282_v4 }
  0xf0   : > { %v284_v6 = vsel %vm276_vm0, %v283_v5, 0.0 }
  0xf1   : > { %285 = vadd.xlane.f32.xlu0 %v284_v6 }
 0x17e   : > { %v286_v10 = vpop.xlane.xlu0 %285 }
 0x17f   : > { %v287_v11 = vmul.f32 0.03125, %v286_v10 }
 0x181   : > { %v288_v12 = vadd.f32 1e-05, %v287_v11 }
 0x183   : > { %591 = vrsqrt.f32 %v288_v12 }
 0x18d   : > { %v592_v13 = vpop.eup %591 }
 0x18e   : > { %v290_v15 = vmul.f32 %v592_v13, %v282_v4 }
 0x190   : > { %v297_v17 = vmul.f32 %v491_v14, %v290_v15 }
 0x192   : > { %v304_v18 = vadd.f32 %v492_v16, %v297_v17 }
 0x194   : > { %v305_v19 = vpack.c.bf16 %v304_v18, %v304_v18 }
 0x196   : > { %509 = vmatmul.mubr.msk.bf16.vlgmr.msra.gmra.mrb[0].mxu0 %vm276_vm0, %v305_v19 }
 0x269   : > { %v366_v21 = vpop.f32.mrb[0].mxu0 }
 0x26a   : > { %v367_v22 = vadd.f32 %v493_v20, %v366_v21  ;;  %v510_v23 = vpop.f32.mrb[1].mxu0 }
 0x26b   : > { %v369_v24 = vpop.f32.mrb[2].mxu0 }
 0x26c   : > { %v372_v25 = vpack.c.bf16 %v367_v22, %v367_v22  ;;  %v511_v26 = vpop.f32.mrb[3].mxu0 }
 0x26e   : > { %374 = vst.msk [vmem:[%s271_s27] sm:$0xf] %vm373_vm2, %v372_v25 }
 0x26f   : > { %664 = shalt.err (!%p661_p5)
}
 0x270   : > { %s665_s8 = scalar_lea.hbm %s954_s12, 64  ;;  %s669_s10 = scalar_lea.hbm %s1008_s5, 128 }
 0x271   : > { %p666_p9 = scmp.ne.s32.totalorder %s954_s12, %s665_s8  ;;  %p670_p7 = scmp.lt.u32.totalorder %s954_s12, %s1008_s5 }
 0x272   : > { %p671_p3 = scmp.lt.u32.totalorder %s669_s10, %s665_s8  ;;  %p673_p13 = scmp.lt.u32.totalorder %s665_s8, %s954_s12 }
 0x273   : > { %p667_p1 = pnand %p666_p9, %p872_p10 }
 0x274   : > { %p672_p4 = por %p671_p3, %p670_p7 }
 0x275   : > { %p668_p2 = pneg %p667_p1 }
 0x276   : > { %p674_p6 = por %p673_p13, %p672_p4 }
 0x278   : > { %p675_p8 = pnand %p674_p6, %p668_p2 }
 0x27a   : > { %678 = shalt.err (!%p675_p8)
}
 0x27b   : > { %518 = dma.vmem_to_hbm [thread:$0]  (%p872_p10), %s956_s14, 64, %s954_s12, %s376_s21  }
 0x27c PF: > { %s402_s27 = sand.u32 1, %s717_s18   ;;  %p1026_p12 = scmp.ne.s32.totalorder %s1016_s29, 0 }
 0x27d   : > { %p1027_p11 = scmp.ge.s32.totalorder %s737_s23, 2  ;;  %s403_s16 = scalar_lea.sflag [#allocation4], %s402_s27 }
 0x27f   : > { %p529_p0 = pnand %p1027_p11, %p1026_p12 }
 0x281   : > { %712 = dma.done.wait (!%p529_p0), %s403_s16, 64  }
 0x282   : > { %714 = vsyncadd (!%p529_p0), %s403_s16, 4294967232  ;;  %s22_s23 = sadd.s32 1, %s737_s23   ;;  %s1028_s18 = smov %s721_s19 }
 0x283   : > { %p19_p5 = scmp.ge.s32.totalorder %s22_s23, 4   ;;  %s1029_s19 = smov %s725_s20 }
 0x284   : > { %s1030_s20 = smov %s881_s15  ;;  %s1031_s21 = smov %s733_s22 }
 0x285   : > { %s1032_s22 = smov %s1034_s9  ;;  %21 = sbr.rel (!%p19_p5) target bundleno = 7 (0x7), region = 89 }
 0x28c   :  { %408 = vsyncpa [#allocation3], 1 }
 0x28d   :  { %410 = vsyncpa [#allocation3 + $0x1], 1 }
 0x28e   :  { %411 = vsyncpa [#allocation6], 1 }
 0x28f   :  { %412 = vsyncpa [#allocation4], 1 }
 0x290   :  { %414 = vsyncpa [#allocation4 + $0x1], 1 }

</bundles_post_ra>
